<compile_context>
chip_gen: v7x
topology: tpu7x:2x2x1
jax: 0.10.0
libtpu: 0.0.40
codegen_flags: <defaults>
</compile_context>

<pallas_src>
import functools
import math

import jax
import jax.numpy as jnp
from jax.experimental import pallas as pl
from jax.experimental.pallas import tpu as pltpu

_COMPUTE_DTYPE = jnp.bfloat16


def _vmem_limit_bytes():
    """~75% of physical VMEM, capped at 96 MiB (v5e/v6e -> 96 MiB, v7x -> 48 MiB)."""
    try:
        cap = getattr(pltpu.get_tpu_info(), "vmem_capacity_bytes", None)
        if cap:
            return min(int(cap) * 3 // 4, 96 * 1024 * 1024)
    except Exception:
        pass
    return 48 * 1024 * 1024


_VMEM_LIMIT = _vmem_limit_bytes()


# ------------------------------ helpers -------------------------------------

def _pick_tile(dim, target, align):
    """Largest `align`-multiple divisor of dim that is <= target (or dim itself)."""
    if dim <= target:
        return dim
    t = (target // align) * align
    while t >= align:
        if dim % t == 0:
            return t
        t -= align
    return dim


def _pick_head_group(num_heads, dh):
    """Smallest head group so group*dh is lane dense (128-multiple), else all heads."""
    for hg in range(1, num_heads + 1):
        if num_heads % hg == 0 and (hg * dh) % 128 == 0:
            return hg
    return num_heads


# ----------------------------- Pallas kernels -------------------------------

def _linear_kernel(x_ref, w_ref, b_ref, o_ref, acc_ref, *, activation):
    @pl.when(pl.program_id(2) == 0)
    def _init():
        acc_ref[...] = jnp.zeros_like(acc_ref)

    acc_ref[...] += jnp.dot(x_ref[...], w_ref[...],
                            preferred_element_type=jnp.float32)

    @pl.when(pl.program_id(2) == pl.num_programs(2) - 1)
    def _done():
        y = acc_ref[...] + b_ref[...].astype(jnp.float32)
        if activation == "gelu":
            # TODO(synk): BERT uses exact (erf) GELU; tanh approximation used here.
            y = jax.nn.gelu(y, approximate=True)
        o_ref[...] = y.astype(o_ref.dtype)


def _linear_res_kernel(x_ref, w_ref, b_ref, o_ref, *, activation):
    # full weight resident in VMEM -> single dot over the whole K dim
    y = jnp.dot(x_ref[...], w_ref[...], preferred_element_type=jnp.float32)
    y = y + b_ref[...].astype(jnp.float32)
    if activation == "gelu":
        y = jax.nn.gelu(y, approximate=True)
    o_ref[...] = y.astype(o_ref.dtype)


def _qkv_kernel(x_ref, wq_ref, wk_ref, wv_ref, bq_ref, bk_ref, bv_ref,
                q_ref, k_ref, v_ref):
    # all three (D, D) weights resident in VMEM; x read once per row tile
    x = x_ref[...]
    q = jnp.dot(x, wq_ref[...], preferred_element_type=jnp.float32)
    k = jnp.dot(x, wk_ref[...], preferred_element_type=jnp.float32)
    v = jnp.dot(x, wv_ref[...], preferred_element_type=jnp.float32)
    q_ref[...] = (q + bq_ref[...].astype(jnp.float32)).astype(q_ref.dtype)
    k_ref[...] = (k + bk_ref[...].astype(jnp.float32)).astype(k_ref.dtype)
    v_ref[...] = (v + bv_ref[...].astype(jnp.float32)).astype(v_ref.dtype)


def _ln_kernel(x_ref, g_ref, b_ref, o_ref, *, eps):
    x = x_ref[...].astype(jnp.float32)
    mu = jnp.mean(x, axis=-1, keepdims=True)
    var = jnp.mean((x - mu) * (x - mu), axis=-1, keepdims=True)
    y = (x - mu) * jax.lax.rsqrt(var + eps) * g_ref[...] + b_ref[...]
    o_ref[...] = y.astype(o_ref.dtype)


def _add_ln_kernel(x_ref, r_ref, g_ref, b_ref, o_ref, *, eps):
    # residual add fused into LayerNorm (saves one HBM round trip per residual)
    x = x_ref[...].astype(jnp.float32) + r_ref[...].astype(jnp.float32)
    mu = jnp.mean(x, axis=-1, keepdims=True)
    var = jnp.mean((x - mu) * (x - mu), axis=-1, keepdims=True)
    y = (x - mu) * jax.lax.rsqrt(var + eps) * g_ref[...] + b_ref[...]
    o_ref[...] = y.astype(o_ref.dtype)


# NT matmul dimension numbers: contract lhs dim 1 with rhs dim 1 (no k.T relayout)
_TRANS_B_DIMS = (((1,), (1,)), ((), ()))


def _attn_kernel(bias_ref, q_ref, k_ref, v_ref, o_ref, *, hg, dh):
    # 1/sqrt(dh) scale is already folded into wq/bq; q/k/v stay bf16 on the MXU.
    # TODO(synk): for S > ~1024 this should become a flash-style KV-tiled kernel
    #             with a fori_loop over heads to bound (S,S) live ranges.
    bias = bias_ref[...]                                    # (1, S) additive mask, f32
    outs = []
    for h in range(hg):                                     # small static unroll
        sl = pl.ds(h * dh, dh)
        q = q_ref[:, sl]                                    # (S, dh) bf16
        k = k_ref[:, sl]                                    # (S, dh) bf16
        v = v_ref[:, sl]                                    # (S, dh) bf16
        s = jax.lax.dot_general(q, k, dimension_numbers=_TRANS_B_DIMS,
                                preferred_element_type=jnp.float32)   # (S, S) f32
        s = s + bias
        s = s - jnp.max(s, axis=-1, keepdims=True)
        p = jnp.exp(s)                                      # unnormalized, in [0, 1]
        denom = jnp.sum(p, axis=-1, keepdims=True)
        o = jnp.dot(p.astype(v.dtype), v, preferred_element_type=jnp.float32)
        # deferred normalization on the small (S, dh) output instead of (S, S)
        o = o * pl.reciprocal(denom, approx=True)
        outs.append(o)
    grp = outs[0] if hg == 1 else jnp.concatenate(outs, axis=-1)
    o_ref[...] = grp.astype(o_ref.dtype)                    # one lane-dense store


def _pool_norm_kernel(h_ref, m_ref, o_ref):
    # masked mean pooling over sequence + L2 normalize (per batch element), f32
    h = h_ref[...].astype(jnp.float32)                       # (S, D)
    m = m_ref[...]                                           # (S, 1) f32
    summed = jnp.sum(h * m, axis=0, keepdims=True)           # (1, D)
    denom = jnp.maximum(jnp.sum(m, axis=0, keepdims=True), 1e-9)
    emb = summed / denom
    norm = jnp.sqrt(jnp.sum(emb * emb, axis=1, keepdims=True))
    o_ref[...] = emb / jnp.maximum(norm, 1e-12)              # F.normalize eps


# ----------------------------- Pallas wrappers ------------------------------

def linear(x, w, b, activation=None, out_dtype=_COMPUTE_DTYPE,
           tm=2048, tn=1024, tk=512):
    """K-tiled matmul with f32 VMEM accumulator (used for the FFN matmuls)."""
    n, din = x.shape
    dout = w.shape[1]
    tm = _pick_tile(n, tm, 16)
    tn = _pick_tile(dout, tn, 128)
    tk = _pick_tile(din, tk, 128)
    return pl.pallas_call(
        functools.partial(_linear_kernel, activation=activation),
        grid=(n // tm, dout // tn, din // tk),
        out_shape=jax.ShapeDtypeStruct((n, dout), out_dtype),
        in_specs=[pl.BlockSpec((tm, tk), lambda i, j, k: (i, k)),
                  pl.BlockSpec((tk, tn), lambda i, j, k: (k, j)),
                  pl.BlockSpec((1, tn), lambda i, j, k: (0, j))],
        out_specs=pl.BlockSpec((tm, tn), lambda i, j, k: (i, j)),
        scratch_shapes=[pltpu.VMEM((tm, tn), jnp.float32)],
        compiler_params=pltpu.CompilerParams(
            dimension_semantics=("parallel", "parallel", "arbitrary"),
            vmem_limit_bytes=_VMEM_LIMIT),
    )(x, w, b)


def linear_resident(x, w, b, activation=None, out_dtype=_COMPUTE_DTYPE, tm=1024):
    """Matmul with the full weight resident in VMEM (for D x D projections)."""
    n, din = x.shape
    dout = w.shape[1]
    tm = _pick_tile(n, tm, 16)
    return pl.pallas_call(
        functools.partial(_linear_res_kernel, activation=activation),
        grid=(n // tm,),
        out_shape=jax.ShapeDtypeStruct((n, dout), out_dtype),
        in_specs=[pl.BlockSpec((tm, din), lambda i: (i, 0)),
                  pl.BlockSpec((din, dout), lambda i: (0, 0)),   # resident weight
                  pl.BlockSpec((1, dout), lambda i: (0, 0))],
        out_specs=pl.BlockSpec((tm, dout), lambda i: (i, 0)),
        compiler_params=pltpu.CompilerParams(
            dimension_semantics=("parallel",),
            vmem_limit_bytes=_VMEM_LIMIT),
    )(x, w, b)


def qkv_projection(x, wq, wk, wv, bq, bk, bv, out_dtype=_COMPUTE_DTYPE, tm=1024):
    """Fused Q/K/V projection; all three (D, D) weights resident in VMEM."""
    n, din = x.shape
    dout = wq.shape[1]
    tm = _pick_tile(n, tm, 16)
    shp = jax.ShapeDtypeStruct((n, dout), out_dtype)
    row_spec = pl.BlockSpec((tm, dout), lambda i: (i, 0))
    w_spec = pl.BlockSpec((din, dout), lambda i: (0, 0))
    b_spec = pl.BlockSpec((1, dout), lambda i: (0, 0))
    return pl.pallas_call(
        _qkv_kernel,
        grid=(n // tm,),
        out_shape=(shp, shp, shp),
        in_specs=[pl.BlockSpec((tm, din), lambda i: (i, 0)),
                  w_spec, w_spec, w_spec, b_spec, b_spec, b_spec],
        out_specs=(row_spec, row_spec, row_spec),
        compiler_params=pltpu.CompilerParams(
            dimension_semantics=("parallel",),
            vmem_limit_bytes=_VMEM_LIMIT),
    )(x, wq, wk, wv, bq, bk, bv)


def layer_norm(x, g, b, residual=None, eps=1e-12, out_dtype=_COMPUTE_DTYPE,
               block_rows=1024):
    n, d = x.shape
    tm = _pick_tile(n, block_rows, 8)
    row_spec = pl.BlockSpec((tm, d), lambda i: (i, 0))
    vec_spec = pl.BlockSpec((1, d), lambda i: (0, 0))
    if residual is None:
        kern = functools.partial(_ln_kernel, eps=eps)
        in_specs = [row_spec, vec_spec, vec_spec]
        args = (x, g, b)
    else:
        kern = functools.partial(_add_ln_kernel, eps=eps)
        in_specs = [row_spec, row_spec, vec_spec, vec_spec]
        args = (x, residual, g, b)
    return pl.pallas_call(
        kern,
        grid=(n // tm,),
        out_shape=jax.ShapeDtypeStruct((n, d), out_dtype),
        in_specs=in_specs,
        out_specs=row_spec,
        compiler_params=pltpu.CompilerParams(
            dimension_semantics=("parallel",),
            vmem_limit_bytes=_VMEM_LIMIT),
    )(*args)


def attention(q, k, v, mask_bias, num_heads):
    """Per-(batch, head-group) attention. Scale already folded into wq/bq."""
    B, S, D = q.shape
    dh = D // num_heads
    hg = _pick_head_group(num_heads, dh)     # heads per grid step (lane density)
    n_groups = num_heads // hg
    hgd = hg * dh

    grp_spec = pl.BlockSpec((None, S, hgd), lambda b, g: (b, 0, g))
    out = pl.pallas_call(
        functools.partial(_attn_kernel, hg=hg, dh=dh),
        grid=(B, n_groups),
        out_shape=jax.ShapeDtypeStruct((B, S, D), q.dtype),
        in_specs=[pl.BlockSpec((None, 1, S), lambda b, g: (b, 0, 0)),
                  grp_spec, grp_spec, grp_spec],
        out_specs=grp_spec,
        compiler_params=pltpu.CompilerParams(
            dimension_semantics=("parallel", "parallel"),
            vmem_limit_bytes=_VMEM_LIMIT),
    )(mask_bias, q, k, v)
    return out


def mean_pool_normalize(hidden, attention_mask):
    B, S, D = hidden.shape
    mask = attention_mask.astype(jnp.float32).reshape(B, S, 1)   # compact mask
    out = pl.pallas_call(
        _pool_norm_kernel,
        grid=(B,),
        out_shape=jax.ShapeDtypeStruct((B, 1, D), jnp.float32),
        in_specs=[pl.BlockSpec((None, S, D), lambda b: (b, 0, 0)),
                  pl.BlockSpec((None, S, 1), lambda b: (b, 0, 0))],
        out_specs=pl.BlockSpec((None, 1, D), lambda b: (b, 0, 0)),
        compiler_params=pltpu.CompilerParams(dimension_semantics=("parallel",)),
    )(hidden, mask)
    return out.reshape(B, D)


# --------------------------- parameter construction -------------------------

def init_params(key, *, vocab, max_seq, hidden, intermediate, num_layers, lora_r):
    keys = iter(jax.random.split(key, 64))

    def w(shape, scale=0.02):
        return (scale * jax.random.normal(next(keys), shape)).astype(jnp.float32)

    params = {
        "word_emb": w((vocab, hidden)),
        "pos_emb": w((max_seq, hidden)),
        "type_emb": w((1, hidden)),
        "emb_ln_g": jnp.ones((1, hidden), jnp.float32),
        "emb_ln_b": jnp.zeros((1, hidden), jnp.float32),
        "layers": [],
    }
    for _ in range(num_layers):
        params["layers"].append({
            # attention projections (weights stored as (in, out) = W^T of torch)
            "wq": w((hidden, hidden)), "bq": jnp.zeros((1, hidden), jnp.float32),
            "wk": w((hidden, hidden)), "bk": jnp.zeros((1, hidden), jnp.float32),
            "wv": w((hidden, hidden)), "bv": jnp.zeros((1, hidden), jnp.float32),
            "wo": w((hidden, hidden)), "bo": jnp.zeros((1, hidden), jnp.float32),
            # LoRA adapters on query / value (PEFT default target modules).
            # PEFT inits B=0; small nonzero values here to exercise the path.
            "Aq": w((hidden, lora_r)), "Bq": w((lora_r, hidden)),
            "Av": w((hidden, lora_r)), "Bv": w((lora_r, hidden)),
            "ln1_g": jnp.ones((1, hidden), jnp.float32),
            "ln1_b": jnp.zeros((1, hidden), jnp.float32),
            "w1": w((hidden, intermediate)), "b1": jnp.zeros((1, intermediate), jnp.float32),
            "w2": w((intermediate, hidden)), "b2": jnp.zeros((1, hidden), jnp.float32),
            "ln2_g": jnp.ones((1, hidden), jnp.float32),
            "ln2_b": jnp.zeros((1, hidden), jnp.float32),
        })
    return params


def fold_lora_and_cast(params, lora_scaling, num_heads, dtype=_COMPUTE_DTYPE):
    """Inference prep: W' = W + scaling * A @ B (LoRA fold), fold the 1/sqrt(dh)
    attention scale into wq/bq, and cast matmul weights to bf16.

    Mathematically identical to the PEFT LoRA forward at eval time (dropout off).
    """
    # TODO(synk): if LoRA-delta fidelity matters, keep folded Q/V weights in f32.
    out = {k: params[k] for k in
           ("word_emb", "pos_emb", "type_emb", "emb_ln_g", "emb_ln_b")}
    out["layers"] = []
    for lyr in params["layers"]:
        hidden = lyr["wq"].shape[0]
        attn_scale = 1.0 / math.sqrt(hidden // num_heads)
        wq = (lyr["wq"] + lora_scaling * (lyr["Aq"] @ lyr["Bq"])) * attn_scale
        bq = lyr["bq"] * attn_scale
        wv = lyr["wv"] + lora_scaling * (lyr["Av"] @ lyr["Bv"])
        out["layers"].append({
            "wq": wq.astype(dtype), "bq": bq,
            "wk": lyr["wk"].astype(dtype), "bk": lyr["bk"],
            "wv": wv.astype(dtype), "bv": lyr["bv"],
            "wo": lyr["wo"].astype(dtype), "bo": lyr["bo"],
            "ln1_g": lyr["ln1_g"], "ln1_b": lyr["ln1_b"],
            "w1": lyr["w1"].astype(dtype), "b1": lyr["b1"],
            "w2": lyr["w2"].astype(dtype), "b2": lyr["b2"],
            "ln2_g": lyr["ln2_g"], "ln2_b": lyr["ln2_b"],
        })
    return out


# ------------------------------- forward pass --------------------------------

def lora_bge_forward(params, input_ids, attention_mask, *, num_heads):
    B, S = input_ids.shape
    D = params["word_emb"].shape[1]
    N = B * S

    # embeddings (plain-JAX glue): word + position + token-type(0), then LayerNorm
    h = (jnp.take(params["word_emb"], input_ids, axis=0)
         + params["pos_emb"][None, :S, :]
         + params["type_emb"][None, :, :])
    h = layer_norm(h.reshape(N, D), params["emb_ln_g"], params["emb_ln_b"])

    # additive attention bias, computed once: 0 for valid keys, -1e9 for padding
    mask_bias = ((attention_mask.astype(jnp.float32) - 1.0) * 1e9).reshape(B, 1, S)

    for lyr in params["layers"]:
        q, k, v = qkv_projection(h, lyr["wq"], lyr["wk"], lyr["wv"],
                                 lyr["bq"], lyr["bk"], lyr["bv"])
        attn = attention(q.reshape(B, S, D), k.reshape(B, S, D), v.reshape(B, S, D),
                         mask_bias, num_heads)
        attn_out = linear_resident(attn.reshape(N, D), lyr["wo"], lyr["bo"])
        h = layer_norm(attn_out, lyr["ln1_g"], lyr["ln1_b"], residual=h)

        ffn = linear(h, lyr["w1"], lyr["b1"], activation="gelu")
        ffn = linear(ffn, lyr["w2"], lyr["b2"])
        h = layer_norm(ffn, lyr["ln2_g"], lyr["ln2_b"], residual=h)

    last_hidden = h.reshape(B, S, D)                    # model_output[0]
    # mean_pooling + F.normalize(p=2, dim=1)
    return mean_pool_normalize(last_hidden, attention_mask)


# ----------------------------------- main ------------------------------------

if __name__ == "__main__":
    # small shapes consistent with the module's forward
    B, S, D = 2, 8, 32
    VOCAB, HEADS, INTER, LAYERS = 100, 2, 64, 2
    LORA_R, LORA_ALPHA = 4, 8
    scaling = LORA_ALPHA / LORA_R

    key = jax.random.PRNGKey(0)
    k_params, k_ids = jax.random.split(key)
    params = init_params(k_params, vocab=VOCAB, max_seq=S, hidden=D,
                         intermediate=INTER, num_layers=LAYERS, lora_r=LORA_R)
    inf_params = fold_lora_and_cast(params, scaling, num_heads=HEADS)

    input_ids = jax.random.randint(k_ids, (B, S), 0, VOCAB, dtype=jnp.int32)
    # second sequence padded after 5 tokens
    attention_mask = jnp.array([[1, 1, 1, 1, 1, 1, 1, 1],
                                [1, 1, 1, 1, 1, 0, 0, 0]], dtype=jnp.int32)

    emb = lora_bge_forward(inf_params, input_ids, attention_mask, num_heads=HEADS)
    emb = jax.block_until_ready(emb)

    assert emb.shape == (B, D)
    # embeddings are L2-normalized (final normalize kept in f32)
    norms = jnp.linalg.norm(emb, axis=1)
    assert bool(jnp.all(jnp.abs(norms - 1.0) < 1e-4))
    print("KERNEL_OK")
</pallas_src>

<mosaic_0001>
module attributes {stable_mosaic.version = 11 : i64} {
  func.func @_ln_kernel(%arg0: i32, %arg1: memref<16x32xf32, #tpu.memory_space<vmem>>, %arg2: memref<1x32xf32, #tpu.memory_space<vmem>>, %arg3: memref<1x32xf32, #tpu.memory_space<vmem>>, %arg4: memref<16x32xbf16, #tpu.memory_space<vmem>>) attributes {dimension_semantics = [#tpu.dimension_semantics<parallel>], iteration_bounds = array<i64: 1>, scalar_prefetch = 0 : i64, scratch_operands = 0 : i64, tpu.core_type = #tpu.core_type<tc>, window_params = [{transform_indices = @transform_0, window_bounds = array<i64: 16, 32>}, {pipeline_mode = #tpu.pipeline_mode<synchronous>, transform_indices = @transform_1, window_bounds = array<i64: 1, 32>}, {pipeline_mode = #tpu.pipeline_mode<synchronous>, transform_indices = @transform_2, window_bounds = array<i64: 1, 32>}, {transform_indices = @transform_3, window_bounds = array<i64: 16, 32>}]} {
    %c0 = arith.constant 0 : index
    %c0_0 = arith.constant 0 : index
    %0 = vector.load %arg1[%c0, %c0_0] : memref<16x32xf32, #tpu.memory_space<vmem>>, vector<16x32xf32>
    %cst = arith.constant dense<0.000000e+00> : vector<16xf32>
    %1 = vector.multi_reduction <add>, %0, %cst [1] : vector<16x32xf32> to vector<16xf32>
    %2 = vector.shape_cast %1 : vector<16xf32> to vector<16x1xf32>
    %cst_1 = arith.constant 3.200000e+01 : f32
    %3 = vector.broadcast %cst_1 : f32 to vector<16x1xf32>
    %4 = arith.divf %2, %3 : vector<16x1xf32>
    %5 = vector.broadcast %4 : vector<16x1xf32> to vector<16x32xf32>
    %6 = arith.subf %0, %5 : vector<16x32xf32>
    %7 = vector.broadcast %4 : vector<16x1xf32> to vector<16x32xf32>
    %8 = arith.subf %0, %7 : vector<16x32xf32>
    %9 = arith.mulf %6, %8 : vector<16x32xf32>
    %cst_2 = arith.constant dense<0.000000e+00> : vector<16xf32>
    %10 = vector.multi_reduction <add>, %9, %cst_2 [1] : vector<16x32xf32> to vector<16xf32>
    %11 = vector.shape_cast %10 : vector<16xf32> to vector<16x1xf32>
    %cst_3 = arith.constant 3.200000e+01 : f32
    %12 = vector.broadcast %cst_3 : f32 to vector<16x1xf32>
    %13 = arith.divf %11, %12 : vector<16x1xf32>
    %14 = vector.broadcast %4 : vector<16x1xf32> to vector<16x32xf32>
    %15 = arith.subf %0, %14 : vector<16x32xf32>
    %cst_4 = arith.constant 9.99999996E-13 : f32
    %16 = vector.broadcast %cst_4 : f32 to vector<16x1xf32>
    %17 = arith.addf %13, %16 : vector<16x1xf32>
    %18 = math.rsqrt %17 : vector<16x1xf32>
    %19 = vector.broadcast %18 : vector<16x1xf32> to vector<16x32xf32>
    %20 = arith.mulf %15, %19 : vector<16x32xf32>
    %c0_5 = arith.constant 0 : index
    %c0_6 = arith.constant 0 : index
    %21 = vector.load %arg2[%c0_5, %c0_6] : memref<1x32xf32, #tpu.memory_space<vmem>>, vector<1x32xf32>
    %22 = vector.broadcast %21 : vector<1x32xf32> to vector<16x32xf32>
    %23 = arith.mulf %20, %22 : vector<16x32xf32>
    %c0_7 = arith.constant 0 : index
    %c0_8 = arith.constant 0 : index
    %24 = vector.load %arg3[%c0_7, %c0_8] : memref<1x32xf32, #tpu.memory_space<vmem>>, vector<1x32xf32>
    %25 = vector.broadcast %24 : vector<1x32xf32> to vector<16x32xf32>
    %26 = arith.addf %23, %25 : vector<16x32xf32>
    %27 = arith.truncf %26 : vector<16x32xf32> to vector<16x32xbf16>
    %c0_9 = arith.constant 0 : index
    %c0_10 = arith.constant 0 : index
    %28 = vector.load %arg4[%c0_9, %c0_10] : memref<16x32xbf16, #tpu.memory_space<vmem>>, vector<16x32xbf16>
    tpu.vector_store %arg4[%c0_9, %c0_10], %27 {strides = array<i32>} : memref<16x32xbf16, #tpu.memory_space<vmem>>, vector<16x32xbf16>,
    return
  }
  func.func @transform_0(%arg0: i32) -> (i32, i32) {
    %c0_i32 = arith.constant 0 : i32
    %c0_i32_0 = arith.constant 0 : i32
    return %arg0, %c0_i32 : i32, i32
  }
  func.func @transform_1(%arg0: i32) -> (i32, i32) {
    %c0_i32 = arith.constant 0 : i32
    %c0_i32_0 = arith.constant 0 : i32
    %c0_i32_1 = arith.constant 0 : i32
    return %c0_i32, %c0_i32_0 : i32, i32
  }
  func.func @transform_2(%arg0: i32) -> (i32, i32) {
    %c0_i32 = arith.constant 0 : i32
    %c0_i32_0 = arith.constant 0 : i32
    %c0_i32_1 = arith.constant 0 : i32
    return %c0_i32, %c0_i32_0 : i32, i32
  }
  func.func @transform_3(%arg0: i32) -> (i32, i32) {
    %c0_i32 = arith.constant 0 : i32
    %c0_i32_0 = arith.constant 0 : i32
    return %arg0, %c0_i32 : i32, i32
  }
}

</mosaic_0001>

<bundles_post_ra>
// kernel: tpu_custom_call.1
= control target key start
LH: loop header
LB: loop body
LE: loop exit
PB: predicated region body
PF: predicated region fallthrough
CT: control target
= control target key end

     0   :  { %8 = vsyncpa [#allocation3], 0  ;;  %s229_s0 = inlined_call_operand.hbm [shape: f32[16,32], index: 0, kind: input, shape index: {}]   ;;  %s230_s1 = inlined_call_operand.vmem [shape: f32[1,32], index: 1, kind: input, shape index: {}]   ;;  %s231_s2 = inlined_call_operand.vmem [shape: f32[1,32], index: 2, kind: input, shape index: {}]   ;;  %s232_s3 = inlined_call_operand.hbm [shape: bf16[16,32], index: 3, kind: output, shape index: {}]  }
   0x1   :  { %9 = vsyncpa [#allocation4], 0  ;;  %s169_s12 = smov [#allocation2]   ;;  %s121_s16 = scalar_lea.hbm %s229_s0, 256 }
   0x2   :  { %s15_s13 = sshll.u32 %s169_s12, 4  ;;  %p122_p0 = scmp.ne.s32.totalorder %s229_s0, %s121_s16  ;;  %s16_s13 = int_to_ptr.vmem [resolvable:$true] %s15_s13 }
   0x3   :  { %p125_p1 = scmp.lt.u32.totalorder %s121_s16, %s229_s0 }
   0x5   :  { %p127_p2 = pnand %p125_p1, %p122_p0 }
   0x7   :  { %130 = shalt.err (!%p127_p2)
}
   0x8   :  { %s131_s21 = scalar_lea.vmem %s16_s13, 256  ;;  %p136_p4 = scmp.lt.s32.totalorder %s16_s13, %s16_s13 }
   0x9   :  { %p132_p3 = scmp.ne.s32.totalorder %s16_s13, %s131_s21  ;;  %p137_p5 = scmp.lt.s32.totalorder %s131_s21, %s131_s21 }
   0xb   :  { %p138_p6 = por %p137_p5, %p136_p4 }
   0xd   :  { %p139_p7 = pnand %p138_p6, %p132_p3 }
   0xf   :  { %142 = shalt.err (!%p139_p7)
}
  0x10   :  { %s170_s22 = smov 128   ;;  %s171_s23 = smov 8  }
  0x11   :  { %21 = dma.hbm_to_vmem [thread:$0]  %s229_s0, 256, %s16_s13, [#allocation3], %s170_s22, %s170_s22, %s171_s23  }
  0x12   :  { %165 = dma.done.wait [#allocation3], 256  }
  0x13   :  { %166 = vsyncadd [#allocation3], 4294967040  ;;  %vm31_vm0 = vcmask 261120   ;;  %v29_v0 = vld [vmem:[#allocation2] sm:$0xff]  ;;  %v30_v1 = vld [vmem:[#allocation2 + $0x8] sm:$0xff]  ;;  %vm85_vm1 = vcmask 257024  }
  0x14   :  { %v32_v2 = vsel %vm31_vm0, %v29_v0, 0.0  ;;  %v35_v3 = vsel %vm31_vm0, %v30_v1, 0.0  ;;  %v105_v21 = vld [vmem:[%s230_s1] ss:$0 sm:$0xff]  ;;  %s172_s29 = smov [#allocation5]  }
  0x15   :  { %33 = vadd.xlane.f32.xlu0 %v32_v2  ;;  %v106_v23 = vld [vmem:[%s231_s2] ss:$0 sm:$0xff]  ;;  %s93_s30 = sshll.u32 %s172_s29, 4  ;;  %s94_s30 = int_to_ptr.vmem [resolvable:$true] %s93_s30 }
  0x16   :  { %s143_s1 = scalar_lea.vmem %s94_s30, 128  ;;  %p148_p9 = scmp.lt.s32.totalorder %s94_s30, %s94_s30 }
  0x17   :  { %p144_p8 = scmp.ne.s32.totalorder %s94_s30, %s143_s1  ;;  %p149_p10 = scmp.lt.s32.totalorder %s143_s1, %s143_s1 }
  0x19   :  { %36 = vadd.xlane.f32.xlu0 %v35_v3  ;;  %p150_p11 = por %p149_p10, %p148_p9 }
  0x1b   :  { %p151_p12 = pnand %p150_p11, %p144_p8 }
  0xa2   :  { %v34_v4 = vpop.xlane.xlu0 %33 }
  0xa3   :  { %v39_v5 = vmul.f32 0.03125, %v34_v4 }
  0xa5   :  { %v41_v6 = vsub.f32 %v29_v0, %v39_v5 }
  0xa6   :  { %v37_v7 = vpop.xlane.xlu0 %36 }
  0xa7   :  { %v40_v8 = vmul.f32 0.03125, %v37_v7  ;;  %v43_v9 = vmul.f32 %v41_v6, %v41_v6 }
  0xa9   :  { %v42_v10 = vsub.f32 %v30_v1, %v40_v8  ;;  %v45_v11 = vsel %vm31_vm0, %v43_v9, 0.0 }
  0xaa   :  { %46 = vadd.xlane.f32.xlu1 %v45_v11 }
  0xab   :  { %v44_v12 = vmul.f32 %v42_v10, %v42_v10 }
  0xad   :  { %v48_v13 = vsel %vm31_vm0, %v44_v12, 0.0 }
  0xae   :  { %49 = vadd.xlane.f32.xlu1 %v48_v13 }
 0x137   :  { %v47_v14 = vpop.xlane.xlu1 %46 }
 0x138   :  { %v51_v15 = vmul.f32 0.03125, %v47_v14 }
 0x13a   :  { %v53_v16 = vadd.f32 1e-12, %v51_v15 }
 0x13b   :  { %v50_v17 = vpop.xlane.xlu1 %49 }
 0x13c   :  { %117 = vrsqrt.f32 %v53_v16  ;;  %v52_v18 = vmul.f32 0.03125, %v50_v17 }
 0x13e   :  { %v54_v19 = vadd.f32 1e-12, %v52_v18 }
 0x140   :  { %119 = vrsqrt.f32 %v54_v19 }
 0x146   :  { %v118_v20 = vpop.eup %117 }
 0x147   :  { %v57_v22 = vmul.f32 %v118_v20, %v41_v6 }
 0x149   :  { %v66_v24 = vmul.f32 %v105_v21, %v57_v22 }
 0x14a   :  { %v120_v25 = vpop.eup %119 }
 0x14b   :  { %v58_v26 = vmul.f32 %v120_v25, %v42_v10  ;;  %v75_v27 = vadd.f32 %v106_v23, %v66_v24 }
 0x14d   :  { %v67_v28 = vmul.f32 %v105_v21, %v58_v26  ;;  %v109_v29 = vpack.c.bf16 %v75_v27, %v75_v27 }
 0x14f   :  { %v76_v30 = vadd.f32 %v106_v23, %v67_v28  ;;  %86 = vst.msk [vmem:[#allocation5] sm:$0xf] %vm85_vm1, %v109_v29 }
 0x151   :  { %v110_v31 = vpack.c.bf16 %v76_v30, %v76_v30 }
 0x153   :  { %87 = vst.msk [vmem:[#allocation5 + $0x4] sm:$0xf] %vm85_vm1, %v110_v31 }
 0x154   :  { %154 = shalt.err (!%p151_p12)
}
 0x155   :  { %s155_s5 = scalar_lea.hbm %s232_s3, 128 }
 0x156   :  { %p156_p13 = scmp.ne.s32.totalorder %s232_s3, %s155_s5  ;;  %p159_p0 = scmp.lt.u32.totalorder %s155_s5, %s232_s3 }
 0x158   :  { %p161_p1 = pnand %p159_p0, %p156_p13 }
 0x15a   :  { %164 = shalt.err (!%p161_p1)
}
 0x15b   :  { %s173_s10 = smov 64   ;;  %s174_s11 = smov 4  }
 0x15c   :  { %99 = dma.vmem_to_hbm [thread:$0]  %s94_s30, 128, %s232_s3, [#allocation4], %s173_s10, %s173_s10, %s174_s11  }
 0x15d   :  { %167 = dma.done.wait [#allocation4], 128  }
 0x15e   :  { %168 = vsyncadd [#allocation4], 4294967168 }
 0x15f   :  { %103 = vsyncpa [#allocation3], 1 }
 0x160   :  { %104 = vsyncpa [#allocation4], 1 }

</bundles_post_ra>
